<compile_context>
chip_gen: v5e
topology: v5e:2x2
jax: 0.10.0
libtpu: 0.0.40
codegen_flags: <defaults>
</compile_context>

<pallas_src>
import functools

import jax
import jax.numpy as jnp
from jax.experimental import pallas as pl
from jax.experimental.pallas import tpu as pltpu


def _make_sdpa_kernel(apply_dropout: bool, drop_scale: float, thresh_i32: int):
    """Builds the per-(batch) kernel, specialized at trace time on dropout_p."""

    def kernel(scale_ref, q_ref, k_ref, v_ref, *rest):
        if apply_dropout:
            bits_ref, o_ref = rest
        else:
            (o_ref,) = rest

        q = q_ref[0]          # (H, Sq, D)   float32
        k = k_ref[0]          # (H, Sk, D)   float32
        v = v_ref[0]          # (H, Sk, Dvp) float32
        sc = scale_ref[0]     # (H, 1, 1)    precomputed 1 / inv_scale_factor

        # scores = (q @ k^T) * (1 / inv_scale)   -- batched over H, no explicit k.T
        s = jnp.einsum("hqd,hkd->hqk", q, k,
                       preferred_element_type=jnp.float32) * sc

        # softmax along last dim (max-subtracted)
        m = jnp.max(s, axis=-1, keepdims=True)
        e = jnp.exp(s - m)
        denom = jnp.sum(e, axis=-1, keepdims=True)
        inv = pl.reciprocal(denom, approx=True)            # EUP, per-row

        if apply_dropout:
            # fold 1/(1-p) into the row-wise reciprocal (one small multiply)
            attn = e * (inv * jnp.float32(drop_scale))
            # integer-domain keep test: bits (int32-viewed uniform) >= threshold
            keep = bits_ref[0] >= jnp.int32(thresh_i32)
            attn = jnp.where(keep, attn, jnp.zeros_like(attn))
        else:
            attn = e * inv

        out = jnp.einsum("hqk,hkv->hqv", attn, v,
                         preferred_element_type=jnp.float32)
        o_ref[0] = out.astype(o_ref.dtype)

    return kernel


def sdpa_dropout(query, key, value, inv_scale_factor, dropout_p, seed=0):
    """query (B,H,Sq,D), key (B,H,Sk,D), value (B,H,Sk,Dv),
    inv_scale_factor (B,H,1,1) -> output (B,H,Sq,Dv)."""
    B, H, Sq, D = query.shape
    _, _, Sk, _ = key.shape
    Dv = value.shape[-1]

    dropout_p = float(dropout_p)
    if dropout_p >= 1.0:
        # torch.nn.functional.dropout(p=1) zeroes everything
        return jnp.zeros((B, H, Sq, Dv), query.dtype)

    # lane-dense output: pad Dv up to a multiple of 128
    Dvp = ((Dv + 127) // 128) * 128
    value_p = value
    if Dvp != Dv:
        value_p = jnp.pad(value, ((0, 0), (0, 0), (0, 0), (0, Dvp - Dv)))

    # precompute 1 / inv_scale_factor once (multiply in kernel, no divide)
    scale = (1.0 / jnp.asarray(inv_scale_factor, jnp.float32)).reshape(B, H, 1, 1)

    apply_dropout = dropout_p > 0.0
    drop_scale = 1.0 / (1.0 - dropout_p) if apply_dropout else 1.0
    # keep iff bits_i32 >= thresh_i32  <=>  P(keep) = 1 - p   (2^-32-exact)
    thresh_i32 = 0
    if apply_dropout:
        thresh_i32 = int(round(dropout_p * 4294967296.0)) - 2147483648
        thresh_i32 = max(min(thresh_i32, 2**31 - 1), -(2**31))

    kernel = _make_sdpa_kernel(apply_dropout, drop_scale, thresh_i32)

    idx = lambda b: (b, 0, 0, 0)
    in_specs = [
        pl.BlockSpec((1, H, 1, 1), idx),      # 1/inv_scale
        pl.BlockSpec((1, H, Sq, D), idx),     # query
        pl.BlockSpec((1, H, Sk, D), idx),     # key
        pl.BlockSpec((1, H, Sk, Dvp), idx),   # value (lane-padded)
    ]
    args = [scale, query, key, value_p]

    if apply_dropout:
        # TODO(synk): hardware PRNG (pltpu.prng_seed) has no interpret-mode
        # lowering; random bits are generated host-side and masked in-kernel.
        bits = jax.random.bits(jax.random.PRNGKey(int(seed)), (B, H, Sq, Sk),
                               dtype=jnp.uint32)
        bits_i32 = jax.lax.bitcast_convert_type(bits, jnp.int32)
        in_specs.append(pl.BlockSpec((1, H, Sq, Sk), idx))
        args.append(bits_i32)

    out = pl.pallas_call(
        kernel,
        out_shape=jax.ShapeDtypeStruct((B, H, Sq, Dvp), query.dtype),
        grid=(B,),
        in_specs=in_specs,
        out_specs=pl.BlockSpec((1, H, Sq, Dvp), idx),
        compiler_params=pltpu.CompilerParams(
            dimension_semantics=("parallel",)),
    )(*args)

    return out[..., :Dv] if Dvp != Dv else out


def _reference(query, key, value, inv_scale_factor):
    # pure-JAX reference with dropout_p == 0
    s = jnp.einsum("bhqd,bhkd->bhqk", query, key) / inv_scale_factor
    attn = jax.nn.softmax(s, axis=-1)
    return jnp.einsum("bhqk,bhkv->bhqv", attn, value)


if __name__ == "__main__":
    B, H, Sq, Sk, D, Dv = 2, 3, 16, 32, 64, 56

    key0 = jax.random.PRNGKey(0)
    kq, kk, kv = jax.random.split(key0, 3)
    query = jax.random.normal(kq, (B, H, Sq, D), dtype=jnp.float32)
    key_t = jax.random.normal(kk, (B, H, Sk, D), dtype=jnp.float32)
    value = jax.random.normal(kv, (B, H, Sk, Dv), dtype=jnp.float32)
    inv_scale_factor = jnp.full((B, H, 1, 1), 10.0, dtype=jnp.float32)

    # dropout_p = 0.0 path: verify against pure-JAX reference
    out0 = sdpa_dropout(query, key_t, value, inv_scale_factor, dropout_p=0.0)
    out0 = jax.block_until_ready(out0)
    ref0 = _reference(query, key_t, value, inv_scale_factor)
    assert out0.shape == (B, H, Sq, Dv)
    # approx reciprocal in the softmax normalization -> loosened tolerance
    assert jnp.allclose(out0, ref0, atol=1e-2, rtol=1e-2), "mismatch vs reference"

    # dropout_p > 0.0 path: exercise the stochastic branch
    out1 = sdpa_dropout(query, key_t, value, inv_scale_factor, dropout_p=0.3, seed=7)
    out1 = jax.block_until_ready(out1)
    assert out1.shape == (B, H, Sq, Dv)
    assert bool(jnp.all(jnp.isfinite(out1)))

    print("KERNEL_OK")
</pallas_src>

<mosaic_0001>
module attributes {stable_mosaic.version = 11 : i64} {
  func.func @kernel(%arg0: i32, %arg1: memref<1x3x1x1xf32, #tpu.memory_space<vmem>>, %arg2: memref<1x3x16x64xf32, #tpu.memory_space<vmem>>, %arg3: memref<1x3x32x64xf32, #tpu.memory_space<vmem>>, %arg4: memref<1x3x32x128xf32, #tpu.memory_space<vmem>>, %arg5: memref<1x3x16x128xf32, #tpu.memory_space<vmem>>) attributes {dimension_semantics = [#tpu.dimension_semantics<parallel>], iteration_bounds = array<i64: 2>, scalar_prefetch = 0 : i64, scratch_operands = 0 : i64, tpu.core_type = #tpu.core_type<tc>, window_params = [{transform_indices = @transform_0, window_bounds = array<i64: 1, 3, 1, 1>}, {transform_indices = @transform_1, window_bounds = array<i64: 1, 3, 16, 64>}, {transform_indices = @transform_2, window_bounds = array<i64: 1, 3, 32, 64>}, {transform_indices = @transform_3, window_bounds = array<i64: 1, 3, 32, 128>}, {transform_indices = @transform_4, window_bounds = array<i64: 1, 3, 16, 128>}]} {
    %c0 = arith.constant 0 : index
    %c0_0 = arith.constant 0 : index
    %c0_1 = arith.constant 0 : index
    %c0_2 = arith.constant 0 : index
    %0 = vector.load %arg2[%c0, %c0_0, %c0_1, %c0_2] : memref<1x3x16x64xf32, #tpu.memory_space<vmem>>, vector<1x3x16x64xf32>
    %1 = vector.shape_cast %0 : vector<1x3x16x64xf32> to vector<3x16x64xf32>
    %c0_3 = arith.constant 0 : index
    %c0_4 = arith.constant 0 : index
    %c0_5 = arith.constant 0 : index
    %c0_6 = arith.constant 0 : index
    %2 = vector.load %arg3[%c0_3, %c0_4, %c0_5, %c0_6] : memref<1x3x32x64xf32, #tpu.memory_space<vmem>>, vector<1x3x32x64xf32>
    %3 = vector.shape_cast %2 : vector<1x3x32x64xf32> to vector<3x32x64xf32>
    %c0_7 = arith.constant 0 : index
    %c0_8 = arith.constant 0 : index
    %c0_9 = arith.constant 0 : index
    %c0_10 = arith.constant 0 : index
    %4 = vector.load %arg4[%c0_7, %c0_8, %c0_9, %c0_10] : memref<1x3x32x128xf32, #tpu.memory_space<vmem>>, vector<1x3x32x128xf32>
    %5 = vector.shape_cast %4 : vector<1x3x32x128xf32> to vector<3x32x128xf32>
    %c0_11 = arith.constant 0 : index
    %c0_12 = arith.constant 0 : index
    %c0_13 = arith.constant 0 : index
    %c0_14 = arith.constant 0 : index
    %6 = vector.load %arg1[%c0_11, %c0_12, %c0_13, %c0_14] : memref<1x3x1x1xf32, #tpu.memory_space<vmem>>, vector<1x3x1x1xf32>
    %7 = vector.shape_cast %6 : vector<1x3x1x1xf32> to vector<3x1x1xf32>
    "tpu.trace_start"() <{level = 10 : i32, message = "hqd,hkd->hqk"}> : () -> ()
    %cst = arith.constant dense<0.000000e+00> : vector<3x16x32xf32>
    %8 = tpu.matmul %1, %3, %cst {dimension_numbers = #tpu.dot_dimension_numbers<[2], [2], [1], [1], [0, 0, 0, 1, 1, 1], [0], [0]>} : vector<3x16x64xf32>, vector<3x32x64xf32>, vector<3x16x32xf32> -> vector<3x16x32xf32>
    "tpu.trace_stop"() : () -> ()
    %9 = vector.broadcast %7 : vector<3x1x1xf32> to vector<3x16x32xf32>
    %10 = arith.mulf %8, %9 : vector<3x16x32xf32>
    %cst_15 = arith.constant dense<0xFF800000> : vector<3x16xf32>
    %11 = vector.multi_reduction <maximumf>, %10, %cst_15 [2] : vector<3x16x32xf32> to vector<3x16xf32>
    %12 = vector.shape_cast %11 : vector<3x16xf32> to vector<3x16x1xf32>
    %13 = vector.broadcast %12 : vector<3x16x1xf32> to vector<3x16x32xf32>
    %14 = arith.subf %10, %13 : vector<3x16x32xf32>
    %15 = math.exp %14 : vector<3x16x32xf32>
    %cst_16 = arith.constant dense<0.000000e+00> : vector<3x16xf32>
    %16 = vector.multi_reduction <add>, %15, %cst_16 [2] : vector<3x16x32xf32> to vector<3x16xf32>
    %17 = vector.shape_cast %16 : vector<3x16xf32> to vector<3x16x1xf32>
    %18 = tpu.reciprocal %17 {approx = true} : vector<3x16x1xf32> -> vector<3x16x1xf32>
    %19 = vector.broadcast %18 : vector<3x16x1xf32> to vector<3x16x32xf32>
    %20 = arith.mulf %15, %19 : vector<3x16x32xf32>
    "tpu.trace_start"() <{level = 10 : i32, message = "hqk,hkv->hqv"}> : () -> ()
    %cst_17 = arith.constant dense<0.000000e+00> : vector<3x16x128xf32>
    %21 = tpu.matmul %20, %5, %cst_17 {dimension_numbers = #tpu.dot_dimension_numbers<[2], [1], [1], [2], [0, 0, 0, 1, 1, 2], [0], [0]>} : vector<3x16x32xf32>, vector<3x32x128xf32>, vector<3x16x128xf32> -> vector<3x16x128xf32>
    "tpu.trace_stop"() : () -> ()
    %c0_18 = arith.constant 0 : index
    %c0_19 = arith.constant 0 : index
    %c0_20 = arith.constant 0 : index
    %c0_21 = arith.constant 0 : index
    %22 = vector.load %arg5[%c0_18, %c0_19, %c0_20, %c0_21] : memref<1x3x16x128xf32, #tpu.memory_space<vmem>>, vector<1x3x16x128xf32>
    %23 = vector.shape_cast %22 : vector<1x3x16x128xf32> to vector<3x16x128xf32>
    %24 = vector.shape_cast %21 : vector<3x16x128xf32> to vector<1x3x16x128xf32>
    tpu.vector_store %arg5[%c0_18, %c0_19, %c0_20, %c0_21], %24 {strides = array<i32>} : memref<1x3x16x128xf32, #tpu.memory_space<vmem>>, vector<1x3x16x128xf32>,
    return
  }
  func.func @transform_0(%arg0: i32) -> (i32, i32, i32, i32) {
    %c0_i32 = arith.constant 0 : i32
    %c0_i32_0 = arith.constant 0 : i32
    %c0_i32_1 = arith.constant 0 : i32
    %c0_i32_2 = arith.constant 0 : i32
    return %arg0, %c0_i32, %c0_i32_0, %c0_i32_1 : i32, i32, i32, i32
  }
  func.func @transform_1(%arg0: i32) -> (i32, i32, i32, i32) {
    %c0_i32 = arith.constant 0 : i32
    %c0_i32_0 = arith.constant 0 : i32
    %c0_i32_1 = arith.constant 0 : i32
    %c0_i32_2 = arith.constant 0 : i32
    return %arg0, %c0_i32, %c0_i32_0, %c0_i32_1 : i32, i32, i32, i32
  }
  func.func @transform_2(%arg0: i32) -> (i32, i32, i32, i32) {
    %c0_i32 = arith.constant 0 : i32
    %c0_i32_0 = arith.constant 0 : i32
    %c0_i32_1 = arith.constant 0 : i32
    %c0_i32_2 = arith.constant 0 : i32
    return %arg0, %c0_i32, %c0_i32_0, %c0_i32_1 : i32, i32, i32, i32
  }
  func.func @transform_3(%arg0: i32) -> (i32, i32, i32, i32) {
    %c0_i32 = arith.constant 0 : i32
    %c0_i32_0 = arith.constant 0 : i32
    %c0_i32_1 = arith.constant 0 : i32
    %c0_i32_2 = arith.constant 0 : i32
    return %arg0, %c0_i32, %c0_i32_0, %c0_i32_1 : i32, i32, i32, i32
  }
  func.func @transform_4(%arg0: i32) -> (i32, i32, i32, i32) {
    %c0_i32 = arith.constant 0 : i32
    %c0_i32_0 = arith.constant 0 : i32
    %c0_i32_1 = arith.constant 0 : i32
    %c0_i32_2 = arith.constant 0 : i32
    return %arg0, %c0_i32, %c0_i32_0, %c0_i32_1 : i32, i32, i32, i32
  }
}

</mosaic_0001>

<bundles_post_ra>
// kernel: tpu_custom_call.1
= control target key start
LH: loop header
LB: loop body
LE: loop exit
PB: predicated region body
PF: predicated region fallthrough
CT: control target
= control target key end

     0   :  { %s1398_s0 = inlined_call_operand.vmem [shape: f32[2,3,1,1], index: 0, kind: input, shape index: {}]   ;;  %s1399_s1 = inlined_call_operand.hbm [shape: f32[2,3,16,64], index: 1, kind: input, shape index: {}]   ;;  %s1400_s2 = inlined_call_operand.hbm [shape: f32[2,3,32,64], index: 2, kind: input, shape index: {}]   ;;  %s1401_s3 = inlined_call_operand.hbm [shape: f32[2,3,32,128], index: 3, kind: input, shape index: {}]   ;;  %s1402_s4 = inlined_call_operand.hbm [shape: f32[2,3,16,128], index: 4, kind: output, shape index: {}]  }
   0x1   :  { %1409 = sst [smem:[#allocation17_spill]] %s1400_s2 }
   0x2   :  { %9 = vsyncpa [#allocation3], 0 }
   0x3   :  { %11 = vsyncpa [#allocation3 + $0x1], 0 }
   0x4   :  { %12 = vsyncpa [#allocation6], 0 }
   0x5   :  { %14 = vsyncpa [#allocation6 + $0x1], 0 }
   0x6   :  { %15 = vsyncpa [#allocation4], 0 }
   0x7   :  { %17 = vsyncpa [#allocation4 + $0x1], 0  ;;  %s1131_s15 = smov 0   ;;  %s1133_s16 = smov 0  }
   0x8   :  { %s1135_s17 = smov 0   ;;  %s1137_s18 = smov 0  }
   0x9 LB: > { %1410 = sst [smem:[#allocation12_spill]] %s1087_s15  ;;  %s1152_s19 = sadd.s32 4294967295, %s1099_s18   ;;  %s1099_s18 = sphi %s1137_s18, %s1424_s18   ;;  %s1095_s17 = sphi %s1135_s17, %s1426_s17   ;;  %s1091_s16 = sphi %s1133_s16, %s1428_s16   ;;  %s1087_s15 = sphi %s1131_s15, %s1427_s15  }
   0xa   : > { %1411 = sst [smem:[#allocation13_spill]] %s1095_s17  ;;  %s801_s20 = sadd.s32 4294967294, %s1099_s18  }
   0xb   : > { %s1156_s21 = sadd.s32 1, %s1099_s18   ;;  %s56_s22 = sadd.s32 1, %s1095_s17 }
   0xc   : > { %1412 = sst [smem:[#allocation14_spill]] %s1156_s21  ;;  %s53_s23 = ssub.s32 %s1099_s18, %s1156_s21 }
   0xd   : > { %p63_p0 = scmp.ne.s32.totalorder %s1095_s17, %s1091_s16  ;;  %p54_p1 = scmp.eq.s32.totalorder %s53_s23, 0 }
   0xe   : > { %p64_p2 = scmp.eq.s32.totalorder %s1099_s18, 0  ;;  %p69_p3 = scmp.ne.s32.totalorder %s1091_s16, %s1087_s15 }
   0xf   : > { %p70_p4 = scmp.eq.s32.totalorder %s1152_s19, 0  ;;  %p145_p7 = scmp.eq.s32.totalorder %s1152_s19, 1 }
  0x10   : > { %s1168_s24 = scalar_select %p54_p1, %s1095_s17, %s56_s22  }
  0x11   : > { %p65_p5 = por %p64_p2, %p63_p0  ;;  %p1170_p6 = por %p70_p4, %p69_p3 }
  0x12   : > { %1413 = sst [smem:[#allocation15_spill]] %s1168_s24  ;;  %p151_p8 = scmp.eq.s32.totalorder %s801_s20, 1 }
  0x13   : > { %p803_p9 = scmp.ge.s32.totalorder %s1099_s18, 2  ;;  %p871_p10 = scmp.lt.s32.totalorder %s1099_s18, 2 }
  0x14   : > { %p1177_p11 = por %p145_p7, %p63_p0  ;;  %p1181_p12 = por %p151_p8, %p69_p3 }
  0x15   : > { %s1186_s28 = sand.u32 1, %s1095_s17   ;;  %p1188_p13 = pnand %p871_p10, %p65_p5 }
  0x16   : > { %s1416_s27 = scalar_select %p1181_p12, 1, 0 }
  0x17   : > { %s200_s30 = sand.u32 1, %s1099_s18   ;;  %s1403_s5 = smul.u32 96, %s1186_s28 }
  0x18   : > { %1417 = sst [smem:[#allocation16_spill]] %s1416_s27  ;;  %s842_s6 = smul.u32 96, %s1099_s18 }
  0x19   : > { %p807_p0 = scmp.ge.s32.totalorder %s1099_s18, 1  ;;  %p242_p1 = scmp.lt.s32.totalorder %s1099_s18, 3 }
  0x1a   : > { %s1419_s2 = sld [smem:[#allocation17_spill]]  ;;  %s204_s10 = scalar_lea.vmem [#allocation5], %s1403_s5 }
  0x1b   : > { %s212_s11 = sshll.u32 %s204_s10, 4  ;;  %p1204_p2 = pnand %p807_p0, %p242_p1  ;;  %s213_s11 = int_to_ptr.vmem [resolvable:$true] %s212_s11 }
  0x1c   : > { %s1208_s14 = scalar_lea.sflag [#allocation6], %s200_s30  ;;  %p943_p4 = pneg %p1188_p13 }
  0x20   : > { %s209_s9 = scalar_lea.hbm %s1419_s2, %s842_s6  ;;  %s946_s8 = scalar_lea.hbm %s1419_s2, 192 }
  0x21   : > { %s210_s12 = sshll.u32 %s209_s9, 4  ;;  %s211_s12 = int_to_ptr.hbm [resolvable:$true] %s210_s12 }
  0x22   : > { %s939_s20 = sshra.s32 %s211_s12, 4  ;;  %s940_s20 = int_to_ptr.hbm [resolvable:$true] %s939_s20 }
  0x23   : > { %s941_s22 = scalar_lea.hbm %s940_s20, 96  ;;  %p947_p8 = scmp.lt.s32.totalorder %s940_s20, %s1419_s2 }
  0x24   : > { %p942_p3 = scmp.ne.s32.totalorder %s940_s20, %s941_s22  ;;  %p948_p10 = scmp.lt.s32.totalorder %s946_s8, %s941_s22 }
  0x26   : > { %p944_p5 = pnand %p943_p4, %p942_p3  ;;  %p949_p0 = por %p948_p10, %p947_p8 }
  0x28   : > { %p945_p7 = pneg %p944_p5 }
  0x2a   : > { %p950_p1 = pnand %p949_p0, %p945_p7 }
  0x2c   : > { %953 = shalt.err (!%p950_p1)
}
  0x2d   : > { %s1101_s30 = smov 128   ;;  %s1102_s5 = smov 8  }
  0x2e   : > { %863 = dma.hbm_to_vmem [thread:$0]  (!%p1188_p13), %s211_s12, 1536, %s213_s11, %s1208_s14, %s1101_s30, %s1101_s30, %s1102_s5  }
  0x2f   : > { %s839_s23 = smul.u32 48, %s1186_s28  ;;  %s231_s8 = scalar_lea.hbm %s1401_s3, %s842_s6 }
  0x30   : > { %s840_s20 = smul.u32 48, %s1099_s18  ;;  %s232_s27 = sshll.u32 %s231_s8, 4  ;;  %s233_s27 = int_to_ptr.hbm [resolvable:$true] %s232_s27 }
  0x31   : > { %s182_s24 = scalar_lea.vmem [#allocation2], %s839_s23  ;;  %s179_s15 = scalar_lea.sflag [#allocation3], %s1186_s28 }
  0x32   : > { %s187_s2 = scalar_lea.hbm %s1399_s1, %s840_s20  ;;  %s190_s17 = sshll.u32 %s182_s24, 4  ;;  %s191_s17 = int_to_ptr.vmem [resolvable:$true] %s190_s17 }
  0x33   : > { %s188_s21 = sshll.u32 %s187_s2, 4  ;;  %s976_s7 = scalar_lea.hbm %s1399_s1, 96  ;;  %s189_s21 = int_to_ptr.hbm [resolvable:$true] %s188_s21 }
  0x34   : > { %s969_s11 = sshra.s32 %s189_s21, 4  ;;  %s970_s11 = int_to_ptr.hbm [resolvable:$true] %s969_s11 }
  0x35   : > { %s971_s12 = scalar_lea.hbm %s970_s11, 48  ;;  %p977_p8 = scmp.lt.s32.totalorder %s970_s11, %s1399_s1 }
  0x36   : > { %p972_p3 = scmp.ne.s32.totalorder %s970_s11, %s971_s12  ;;  %p978_p10 = scmp.lt.s32.totalorder %s976_s7, %s971_s12 }
  0x38   : > { %p974_p5 = pnand %p972_p3, %p943_p4  ;;  %p979_p0 = por %p978_p10, %p977_p8 }
  0x3a   : > { %p975_p7 = pneg %p974_p5 }
  0x3c   : > { %p980_p1 = pnand %p979_p0, %p975_p7 }
  0x3e   : > { %983 = shalt.err (!%p980_p1)
}
  0x3f   : > { %860 = dma.hbm_to_vmem [thread:$0]  (!%p1188_p13), %s189_s21, 768, %s191_s17, %s179_s15, %s1101_s30, %s1101_s30, %s1102_s5  }
  0x40   : > { %s1421_s2 = smul.u32 96, %s1186_s28  ;;  %s999_s9 = sshra.s32 %s233_s27, 4  ;;  %s1000_s9 = int_to_ptr.hbm [resolvable:$true] %s999_s9 }
  0x41   : > { %s1001_s10 = scalar_lea.hbm %s1000_s9, 96  ;;  %s1006_s6 = scalar_lea.hbm %s1401_s3, 192 }
  0x42   : > { %s226_s24 = scalar_lea.vmem [#allocation7], %s1421_s2  ;;  %p1002_p3 = scmp.ne.s32.totalorder %s1000_s9, %s1001_s10 }
  0x43   : > { %s234_s8 = sshll.u32 %s226_s24, 4  ;;  %p1007_p8 = scmp.lt.s32.totalorder %s1000_s9, %s1401_s3  ;;  %s235_s8 = int_to_ptr.vmem [resolvable:$true] %s234_s8 }
  0x44   : > { %p1004_p5 = pnand %p1002_p3, %p943_p4  ;;  %p1008_p10 = scmp.lt.s32.totalorder %s1006_s6, %s1001_s10 }
  0x46   : > { %p1005_p7 = pneg %p1004_p5  ;;  %p1009_p0 = por %p1008_p10, %p1007_p8 }
  0x48   : > { %p1010_p1 = pnand %p1009_p0, %p1005_p7 }
  0x4a   : > { %1013 = shalt.err (!%p1010_p1)
}
  0x4b   : > { %866 = dma.hbm_to_vmem [thread:$0]  (!%p1188_p13), %s233_s27, 1536, %s235_s8, %s1208_s14, %s1101_s30, %s1101_s30, %s1102_s5  }
  0x4c   : > { %246 = sbr.rel (%p1204_p2) target bundleno = 647 (0x287), region = 36  ;;  %s1272_s15 = sand.u32 (!%p1204_p2), 1, %s1091_s16  }
  0x4d   : > { %s845_s17 = smul.u32 (!%p1204_p2), 48, %s1272_s15  ;;  %s249_s21 = scalar_lea.sflag (!%p1204_p2), [#allocation3], %s1272_s15 }
  0x4f   : > { %s1278_s28 = scalar_lea.vmem (!%p1204_p2), [#allocation2], %s845_s17 }
  0x51   : > { %1074 = dma.done.wait (%p1170_p6), %s249_s21, 768  }
  0x52   : > { %1076 = vsyncadd (%p1170_p6), %s249_s21, 4294966528  ;;  %s258_s27 = sand.u32 1, %s1152_s19   ;;  %s846_s29 = smul.u32 96, %s1272_s15 }
  0x53   : > { %s259_s5 = scalar_lea.sflag [#allocation6], %s258_s27 }
  0x54   : > { %s1288_s13 = scalar_lea.vmem [#allocation5], %s846_s29 }
  0x55   : > { %1078 = dma.done.wait (%p1170_p6), %s259_s5, 3072  }
  0x56   : > { %1080 = vsyncadd (%p1170_p6), %s259_s5, 4294964224  ;;  %p312_p13 = scmp.lt.s32.totalorder %s1152_s19, 1  ;;  %v1103_v0 = vmov 0   ;;  %vm349_vm0 = vcmask 523264   ;;  %v325_v1 = vld [vmem:[%s1288_s13 + $0x18] sm:$0xff]  ;;  %v324_v3 = vld [vmem:[%s1288_s13 + $0x10] sm:$0xff] }
  0x57   : > { %910 = vset.pattern.permute.xlu0 %v1103_v0  ;;  %911 = vset.pattern.permute.xlu1 %v1103_v0  ;;  %v329_v2 = vld [vmem:[%s1288_s13 + $0x38] sm:$0xff]  ;;  %v328_v4 = vld [vmem:[%s1288_s13 + $0x30] sm:$0xff]  ;;  %v323_v8 = vld [vmem:[%s1288_s13 + $0x8] sm:$0xff]  ;;  %vm497_vm1 = vcmask 261120   ;;  %s272_s2 = scalar_lea.vmem [#allocation7], %s846_s29  ;;  %s311_s24 = scalar_lea.vmem [#allocation8], %s845_s17 }
  0x58   : > { %s313_s14 = scalar_select %p312_p13, %s1152_s19, 1  ;;  %808 = vmatpush.xpose.msk.msra.mxu0 %vm349_vm0, %v325_v1  ;;  %814 = vmatpush.xpose.msk.msra.mxu1 %vm349_vm0, %v329_v2  ;;  %v333_v5 = vld [vmem:[%s1288_s13 + $0x58] sm:$0xff]  ;;  %v332_v6 = vld [vmem:[%s1288_s13 + $0x50] sm:$0xff]  ;;  %v327_v9 = vld [vmem:[%s1288_s13 + $0x28] sm:$0xff] }
  0x59   : > { %820 = vmatpush.xpose.msk.msra.mxu2 %vm349_vm0, %v333_v5  ;;  %v331_v11 = vld [vmem:[%s1288_s13 + $0x48] sm:$0xff]  ;;  %v322_v12 = vld [vmem:[%s1288_s13] sm:$0xff]  ;;  %s848_s8 = smul.u32 48, %s1152_s19  ;;  %s670_s12 = sshll.u32 %s311_s24, 4  ;;  %s671_s12 = int_to_ptr.vmem [resolvable:$true] %s670_s12 }
  0x5a   : > { %s847_s30 = smul.u32 3, %s313_s14  ;;  %v326_v13 = vld [vmem:[%s1288_s13 + $0x20] sm:$0xff]  ;;  %v317_v19 = vld [vmem:[%s1278_s28 + $0x8] sm:$0xff]  ;;  %v319_v20 = vld [vmem:[%s1278_s28 + $0x18] sm:$0xff]  ;;  %s658_s22 = scalar_lea.sflag [#allocation4], %s1272_s15 }
  0x5b   : > { %v330_v15 = vld [vmem:[%s1288_s13 + $0x40] sm:$0xff]  ;;  %v321_v21 = vld [vmem:[%s1278_s28 + $0x28] sm:$0xff]  ;;  %s669_s11 = scalar_lea.hbm %s1402_s4, %s848_s8 }
  0x5c   : > { %s315_s23 = scalar_lea.vmem %s1398_s0, %s847_s30  ;;  %809 = vmatpush.xpose.msk.msra.mxu0 %vm349_vm0, %v324_v3  ;;  %815 = vmatpush.xpose.msk.msra.mxu1 %vm349_vm0, %v328_v4  ;;  %v316_v16 = vld [vmem:[%s1278_s28] sm:$0xff]  ;;  %v318_v17 = vld [vmem:[%s1278_s28 + $0x10] sm:$0xff]  ;;  %s672_s6 = sshll.u32 %s669_s11, 4  ;;  %s673_s6 = int_to_ptr.hbm [resolvable:$true] %s672_s6 }
  0x5d   : > { %v912_v7 = vld [vmem:[%s315_s23] ss:$0 sm:$0xff]  ;;  %821 = vmatpush.xpose.msk.msra.mxu2 %vm349_vm0, %v332_v6  ;;  %v914_v10 = vld [vmem:[%s315_s23 + $0x2] ss:$0 sm:$0xff]  ;;  %v913_v14 = vld [vmem:[%s315_s23 + $0x1] ss:$0 sm:$0xff] }
  0x5e   : > { %480 = vperm.xlu0 %910, %v912_v7   ;;  %488 = vperm.xlu1 %911, %v914_v10   ;;  %v320_v18 = vld [vmem:[%s1278_s28 + $0x20] sm:$0xff]  ;;  %s1043_s7 = sshra.s32 %s673_s6, 4  ;;  %s1049_s28 = scalar_lea.hbm %s1402_s4, 96  ;;  %s1044_s7 = int_to_ptr.hbm [resolvable:$true] %s1043_s7 }
  0x5f   : > { %v336_v10 = vld [vmem:[%s272_s2 + $0x10] sm:$0xff]  ;;  %s1045_s19 = scalar_lea.hbm %s1044_s7, 48  ;;  %p1050_p3 = scmp.lt.s32.totalorder %s1044_s7, %s1402_s4 }
  0x60   : > { %810 = vmatpush.xpose.msk.msra.mxu0 %vm349_vm0, %v323_v8  ;;  %816 = vmatpush.xpose.msk.msra.mxu1 %vm349_vm0, %v327_v9  ;;  %v337_v9 = vld [vmem:[%s272_s2 + $0x18] sm:$0xff]  ;;  %p1046_p6 = scmp.ne.s32.totalorder %s1044_s7, %s1045_s19  ;;  %p1051_p5 = scmp.lt.s32.totalorder %s1049_s28, %s1045_s19 }
  0x61   : > { %822 = vmatpush.xpose.msk.msra.mxu2 %vm349_vm0, %v331_v11  ;;  %582 = vmatpush.msra.mxu3 %v337_v9  ;;  %v335_v11 = vld [vmem:[%s272_s2 + $0x8] sm:$0xff] }
  0x62   : > { %p1047_p2 = pnand %p1046_p6, %p1177_p11  ;;  %p1052_p7 = por %p1051_p5, %p1050_p3 }
  0x63   : > { %583 = vmatpush.msra.mxu3 %v336_v10 }
  0x64   : > { %811 = vmatpush.xpose.msk.msra.mxu0 %vm349_vm0, %v322_v12  ;;  %817 = vmatpush.xpose.msk.msra.mxu1 %vm349_vm0, %v326_v13  ;;  %v334_v12 = vld [vmem:[%s272_s2] sm:$0xff]  ;;  %v341_v13 = vld [vmem:[%s272_s2 + $0x38] sm:$0xff]  ;;  %p1048_p4 = pneg %p1047_p2 }
  0x65   : > { %823 = vmatpush.xpose.msk.msra.mxu2 %vm349_vm0, %v330_v15  ;;  %584 = vmatpush.msra.mxu3 %v335_v11  ;;  %v339_v15 = vld [vmem:[%s272_s2 + $0x28] sm:$0xff] }
  0x66   : > { %484 = vperm.xlu0 %910, %v913_v14   ;;  %v340_v14 = vld [vmem:[%s272_s2 + $0x30] sm:$0xff]  ;;  %p1053_p8 = pnand %p1052_p7, %p1048_p4 }
  0x67   : > { %812 = vmatmul.msk.f32.vlgmr.msra.gmra.mxu0 %vm349_vm0, %v316_v16  ;;  %818 = vmatmul.msk.f32.vlgmr.msra.gmra.mxu1 %vm349_vm0, %v318_v17  ;;  %v338_v16 = vld [vmem:[%s272_s2 + $0x20] sm:$0xff]  ;;  %v345_v17 = vld [vmem:[%s272_s2 + $0x58] sm:$0xff] }
  0x68   : > { %824 = vmatmul.msk.f32.vlgmr.msra.gmra.mxu2 %vm349_vm0, %v320_v18  ;;  %585 = vmatpush.msra.mxu3 %v334_v12  ;;  %v344_v18 = vld [vmem:[%s272_s2 + $0x50] sm:$0xff] }
  0x69   : > { %640 = vmatpush.msrb.mxu0 %v345_v17  ;;  %835 = vmatpush.msrb.mxu1 %v345_v17 }
  0x6a   : > { %611 = vmatpush.msrb.mxu3 %v341_v13 }
  0x6b   : > { %641 = vmatpush.msrb.mxu0 %v344_v18  ;;  %836 = vmatpush.msrb.mxu1 %v344_v18 }
  0x6c   : > { %612 = vmatpush.msrb.mxu3 %v340_v14 }
  0x6e   : > { %613 = vmatpush.msrb.mxu3 %v339_v15 }
  0x6f   : > { %813 = vmatmul.msk.f32.gmra.mxu0 %vm349_vm0, %v317_v19  ;;  %819 = vmatmul.msk.f32.gmra.mxu1 %vm349_vm0, %v319_v20  ;;  %v343_v19 = vld [vmem:[%s272_s2 + $0x48] sm:$0xff] }
  0x70   : > { %825 = vmatmul.msk.f32.gmra.mxu2 %vm349_vm0, %v321_v21  ;;  %614 = vmatpush.msrb.mxu3 %v338_v16  ;;  %v342_v21 = vld [vmem:[%s272_s2 + $0x40] sm:$0xff] }
  0x71   : > { %642 = vmatpush.msrb.mxu0 %v343_v19  ;;  %837 = vmatpush.msrb.mxu1 %v343_v19 }
  0x73   : > { %643 = vmatpush.msrb.mxu0 %v342_v21  ;;  %838 = vmatpush.msrb.mxu1 %v342_v21 }
  0xd0   : > { %v481_v22 = vpop.permute.xlu0 %480  ;;  %v489_v36 = vpop.permute.xlu1 %488 }
  0xd8   : > { %v485_v27 = vpop.permute.xlu0 %484 }
  0xe4   : > { %v385_v23 = vpop.f32.mrf.mxu0  ;;  %v426_v24 = vpop.f32.mrf.mxu1 }
  0xe5   : > { %v491_v25 = vmul.f32 %v481_v22, %v385_v23  ;;  %v493_v34 = vmul.f32 %v485_v27, %v426_v24 }
  0xe7   : > { %v498_v26 = vsel %vm497_vm1, %v491_v25, -inf  ;;  %v504_v37 = vsel %vm497_vm1, %v493_v34, -inf }
  0xe8   : > { %499 = vmax.xlane.f32.xlu1 %v498_v26 }
  0xeb   : > { %v467_v35 = vpop.f32.mrf.mxu2 }
  0xec   : > { %v388_v28 = vpop.f32.mrf.mxu0  ;;  %v429_v29 = vpop.f32.mrf.mxu1  ;;  %v495_v38 = vmul.f32 %v489_v36, %v467_v35 }
  0xed   : > { %v492_v30 = vmul.f32 %v481_v22, %v388_v28  ;;  %v494_v31 = vmul.f32 %v485_v27, %v429_v29 }
  0xee   : > { %v510_v39 = vsel %vm497_vm1, %v495_v38, -inf }
  0xef   : > { %v507_v32 = vsel %vm497_vm1, %v494_v31, -inf  ;;  %v501_v33 = vsel %vm497_vm1, %v492_v30, -inf }
  0xf0   : > { %508 = vmax.xlane.f32.xlu0 %v507_v32  ;;  %502 = vmax.xlane.f32.xlu2 %v501_v33 }
  0xf3   : > { %v470_v40 = vpop.f32.mrf.mxu2 }
  0xf4   : > { %v496_v41 = vmul.f32 %v489_v36, %v470_v40 }
  0xf6   : > { %v513_v42 = vsel %vm497_vm1, %v496_v41, -inf }
  0xf8   : > { %505 = vmax.xlane.f32.xlu2 %v504_v37 }
 0x100   : > { %511 = vmax.xlane.f32.xlu2 %v510_v39 }
 0x108   : > { %514 = vmax.xlane.f32.xlu2 %v513_v42 }
 0x15b   : > { %v500_v43 = vpop.xlane.xlu1 %499 }
 0x15c   : > { %v516_v44 = vsub.f32 %v491_v25, %v500_v43 }
 0x15e   : > { %v522_v45 = vmul.f32 1.442695, %v516_v44 }
 0x160   : > { %915 = vpow2.f32 %v522_v45 }
 0x163   : > { %v509_v46 = vpop.xlane.xlu0 %508  ;;  %v503_v47 = vpop.xlane.xlu2 %502 }
 0x164   : > { %v519_v48 = vsub.f32 %v494_v31, %v509_v46  ;;  %v517_v49 = vsub.f32 %v492_v30, %v503_v47 }
 0x166   : > { %v1341_v50 = vpop.eup %915  ;;  %v528_v51 = vmul.f32 1.442695, %v519_v48  ;;  %v524_v52 = vmul.f32 1.442695, %v517_v49 }
 0x167   : > { %v534_v53 = vsel %vm497_vm1, %v1341_v50, 0.0 }
 0x168   : > { %917 = vpow2.f32 %v528_v51  ;;  %535 = vadd.xlane.f32.xlu2 %v534_v53 }
 0x169   : > { %919 = vpow2.f32 %v524_v52 }
 0x16b   : > { %v506_v54 = vpop.xlane.xlu2 %505 }
 0x16c   : > { %v518_v55 = vsub.f32 %v493_v34, %v506_v54 }
 0x16e   : > { %v1345_v56 = vpop.eup %917  ;;  %v526_v57 = vmul.f32 1.442695, %v518_v55 }
 0x16f   : > { %v920_v58 = vpop.eup %919  ;;  %v543_v59 = vsel %vm497_vm1, %v1345_v56, 0.0 }
 0x170   : > { %921 = vpow2.f32 %v526_v57  ;;  %544 = vadd.xlane.f32.xlu1 %v543_v59  ;;  %v537_v60 = vsel %vm497_vm1, %v920_v58, 0.0 }
 0x171   : > { %538 = vadd.xlane.f32.xlu2 %v537_v60 }
 0x173   : > { %v512_v61 = vpop.xlane.xlu2 %511 }
 0x174   : > { %v520_v62 = vsub.f32 %v495_v38, %v512_v61 }
 0x176   : > { %v922_v63 = vpop.eup %921  ;;  %v530_v0 = vmul.f32 1.442695, %v520_v62 }
 0x177   : > { %v540_v1 = vsel %vm497_vm1, %v922_v63, 0.0 }
 0x178   : > { %923 = vpow2.f32 %v530_v0 }
 0x179   : > { %541 = vadd.xlane.f32.xlu2 %v540_v1 }
 0x17b   : > { %v515_v2 = vpop.xlane.xlu2 %514 }
 0x17c   : > { %v521_v3 = vsub.f32 %v496_v41, %v515_v2 }
 0x17e   : > { %v924_v4 = vpop.eup %923  ;;  %v532_v5 = vmul.f32 1.442695, %v521_v3 }
 0x17f   : > { %v546_v6 = vsel %vm497_vm1, %v924_v4, 0.0 }
 0x180   : > { %925 = vpow2.f32 %v532_v5 }
 0x181   : > { %547 = vadd.xlane.f32.xlu2 %v546_v6 }
 0x186   : > { %v926_v7 = vpop.eup %925 }
 0x187   : > { %v549_v8 = vsel %vm497_vm1, %v926_v7, 0.0 }
 0x188   : > { %550 = vadd.xlane.f32.xlu0 %v549_v8 }
 0x1db   : > { %v536_v20 = vpop.xlane.xlu2 %535 }
 0x1dc   : > { %927 = vrcp.f32 %v536_v20 }
 0x1e2   : > { %v928_v22 = vpop.eup %927 }
 0x1e3   : > { %v558_v23 = vmul.f32 %v928_v22, %v1341_v50  ;;  %v545_v28 = vpop.xlane.xlu1 %544 }
 0x1e4   : > { %v539_v24 = vpop.xlane.xlu2 %538 }
 0x1e5   : > { %929 = vrcp.f32 %v539_v24  ;;  %826 = vmatmul.msk.f32.vlgmr.msra.gmra.mxu3 %vm497_vm1, %v558_v23 }
 0x1eb   : > { %v930_v25 = vpop.eup %929 }
 0x1ec   : > { %v542_v26 = vpop.xlane.xlu2 %541  ;;  %v559_v27 = vmul.f32 %v930_v25, %v920_v58 }
 0x1ed   : > { %931 = vrcp.f32 %v542_v26 }
 0x1ee   : > { %827 = vmatmul.msk.f32.gmra.mxu3 %vm497_vm1, %v559_v27  ;;  %933 = vrcp.f32 %v545_v28 }
 0x1f3   : > { %v932_v29 = vpop.eup %931 }
 0x1f4   : > { %v548_v30 = vpop.xlane.xlu2 %547  ;;  %v560_v31 = vmul.f32 %v932_v29, %v922_v63  ;;  %v934_v32 = vpop.eup %933 }
 0x1f5   : > { %935 = vrcp.f32 %v548_v30  ;;  %v561_v36 = vmul.f32 %v934_v32, %v1345_v56 }
 0x1f6   : > { %828 = vmatmul.msk.f32.vlgmr.msrb.gmra.mxu3 %vm497_vm1, %v560_v31 }
 0x1fb   : > { %v936_v33 = vpop.eup %935  ;;  %v551_v34 = vpop.xlane.xlu0 %550 }
 0x1fc   : > { %v562_v35 = vmul.f32 %v936_v33, %v924_v4  ;;  %937 = vrcp.f32 %v551_v34 }
 0x1fe   : > { %829 = vmatmul.msk.f32.gmra.mxu3 %vm497_vm1, %v561_v36  ;;  %830 = vmatmul.msk.f32.vlgmr.msrb.gmra.mxu0 %vm497_vm1, %v562_v35 }
 0x202   : > { %v938_v37 = vpop.eup %937 }
 0x203   : > { %v563_v38 = vmul.f32 %v938_v37, %v926_v7 }
 0x205   : > { %831 = vmatmul.msk.f32.vlgmr.msrb.gmra.mxu1 %vm497_vm1, %v563_v38 }
 0x268   : > { %v587_v39 = vpop.f32.mrf.mxu3 }
 0x269   : > { %651 = vst [vmem:[%s311_s24] sm:$0xff] %v587_v39 }
 0x271   : > { %v590_v40 = vpop.f32.mrf.mxu3 }
 0x272   : > { %652 = vst [vmem:[%s311_s24 + $0x8] sm:$0xff] %v590_v40 }
 0x279   : > { %v616_v41 = vpop.f32.mrf.mxu3 }
 0x27a   : > { %653 = vst [vmem:[%s311_s24 + $0x10] sm:$0xff] %v616_v41 }
 0x27b   : > { %v645_v42 = vpop.f32.mrf.mxu0 }
 0x27c   : > { %655 = vst [vmem:[%s311_s24 + $0x20] sm:$0xff] %v645_v42 }
 0x281   : > { %v619_v43 = vpop.f32.mrf.mxu3 }
 0x282   : > { %654 = vst [vmem:[%s311_s24 + $0x18] sm:$0xff] %v619_v43  ;;  %v648_v44 = vpop.f32.mrf.mxu1 }
 0x283   : > { %656 = vst [vmem:[%s311_s24 + $0x28] sm:$0xff] %v648_v44 }
 0x284   : > { %1056 = shalt.err (!%p1053_p8)
}
 0x285   : > { %s1104_s15 = smov 128   ;;  %s1105_s5 = smov 8  }
 0x286   : > { %855 = dma.vmem_to_hbm [thread:$0]  (%p1177_p11), %s671_s12, 768, %s673_s6, %s658_s22, %s1104_s15, %s1104_s15, %s1105_s5  }
 0x287 PF: > { %s1422_s13 = sld [smem:[#allocation12_spill]]  ;;  %p868_p10 = pnand %p803_p9, %p1181_p12 }
 0x289   : > { %p869_p0 = pneg %p868_p10 }
 0x28d   : > { %s687_s30 = sand.u32 1, %s1422_s13  }
 0x28e   : > { %s688_s25 = scalar_lea.sflag [#allocation4], %s687_s30 }
 0x28f   : > { %1082 = dma.done.wait (%p869_p0), %s688_s25, 768  }
 0x290   : > { %1084 = vsyncadd (%p869_p0), %s688_s25, 4294966528  ;;  %s1424_s18 = sld [smem:[#allocation14_spill]]  ;;  %s1427_s15 = smov %s1091_s16 }
 0x291   : > { %s1425_s20 = sld [smem:[#allocation13_spill]] }
 0x292   : > { %s1426_s17 = sld [smem:[#allocation15_spill]] }
 0x296   : > { %p20_p1 = scmp.ge.s32.totalorder %s1424_s18, 4  }
 0x297   : > { %s1428_s16 = smov %s1425_s20 }
 0x298   :  { %22 = sbr.rel (!%p20_p1) target bundleno = 9 (0x9), region = 108 }
 0x29d   :  { %694 = vsyncpa [#allocation3], 1 }
 0x29e   :  { %696 = vsyncpa [#allocation3 + $0x1], 1 }
 0x29f   :  { %697 = vsyncpa [#allocation6], 1 }
 0x2a0   :  { %699 = vsyncpa [#allocation6 + $0x1], 1 }
 0x2a1   :  { %700 = vsyncpa [#allocation4], 1 }
 0x2a2   :  { %702 = vsyncpa [#allocation4 + $0x1], 1 }

</bundles_post_ra>
